<compile_context>
chip_gen: v5e
topology: v5e:2x2
jax: 0.10.0
libtpu: 0.0.40
codegen_flags: <defaults>
</compile_context>

<pallas_src>
import functools

import jax
import jax.numpy as jnp
from jax.experimental import pallas as pl
from jax.experimental.pallas import tpu as pltpu


def _round_up(n: int, m: int) -> int:
    return ((n + m - 1) // m) * m


def _cdiv(a: int, b: int) -> int:
    return (a + b - 1) // b


def _mlp_verif_kernel(x_ref, w1_ref, b1_ref, wcat_ref, bcat_ref, out_ref,
                      *, n_classes: int):
    C = n_classes
    # In-kernel bf16 cast of the activations (VPU filler, avoids a wrapper HBM pass).
    x = x_ref[...].astype(jnp.bfloat16)

    # hidden = relu(x @ W1 + b1): bf16 MXU inputs, f32 accumulation / VPU math.
    h = jnp.dot(x, w1_ref[...], preferred_element_type=jnp.float32)
    h = jnp.maximum(h + b1_ref[...], 0.0)
    hb = h.astype(jnp.bfloat16)

    # Single fused matmul:  res[:, :C]      = h @ W2        + b2      (logits)
    #                       res[:, C:2C-1]  = h @ (W2 P.T)  + b2 P.T  (verif products)
    #                       res[:, 2C-1:]   = 0 (padded columns)
    res = jnp.dot(hb, wcat_ref[...],
                  preferred_element_type=jnp.float32) + bcat_ref[...]

    # Mask non-verif / padded columns to +inf before the min reduction.
    col = jax.lax.broadcasted_iota(jnp.int32, res.shape, 1)
    is_verif = (col >= C) & (col < 2 * C - 1)
    vmin = jnp.min(jnp.where(is_verif, res, jnp.inf), axis=1, keepdims=True)

    # Place vmin in column C and emit the whole lane-dense slab with one
    # unmasked full-width store. Columns > C keep (discarded) matmul results.
    out_ref[...] = jnp.where(col == C, vmin, res)


def prepare_verification_params(w1, b1, w2, b2, prop):
    """Per-(weights, property) prep, hoisted out of the forward path.

    Folds the property layer into the last Linear and fuses it with W2:
      Wcat = [W2 | W2 @ P.T] padded to a 128-lane multiple (bf16),
      bcat = [b2 | b2 @ P.T] padded likewise (f32).
    """
    H, C = w2.shape
    out_w = _round_up(max(C + 1, 2 * C - 1), 128)

    wcat = jnp.concatenate([w2, w2 @ prop.T], axis=1)          # (H, 2C-1)
    wcat = jnp.pad(wcat, ((0, 0), (0, out_w - (2 * C - 1))))   # (H, out_w)
    bcat = jnp.concatenate([b2, b2 @ prop.T], axis=1)          # (1, 2C-1)
    bcat = jnp.pad(bcat, ((0, 0), (0, out_w - (2 * C - 1))))   # (1, out_w)

    return {
        "w1": w1.astype(jnp.bfloat16),     # (F, H) bf16 (MXU-native)
        "b1": b1,                          # (1, H) f32
        "wcat": wcat.astype(jnp.bfloat16), # (H, out_w) bf16
        "bcat": bcat,                      # (1, out_w) f32
        "n_classes": C,
        "out_w": out_w,
    }


def verification_forward(x, params):
    """Fused forward + forward_verif.

    Args:
      x:      (B, F) float32 inputs (flattened, as for nn.Linear).
      params: output of prepare_verification_params().

    Returns:
      logits (B, C) float32  == forward(x)
      verif  (B, 1) float32  == forward_verif(x, true_class_index)
    """
    B, F = x.shape
    w1, b1 = params["w1"], params["b1"]
    wcat, bcat = params["wcat"], params["bcat"]
    H = w1.shape[1]
    C = params["n_classes"]
    OUT_W = params["out_w"]

    # Large batch tiles (multiple of 16 for bf16 sublane packing); ragged B handled
    # by Pallas edge-block masking (no wrapper-side pad copy).
    TB = min(1024, _round_up(B, 16))
    # v7x has 2 TensorCores: if the batch spans >= 2 tiles of 16, make sure the
    # "parallel" grid axis has >= 2 steps so megacore sharding actually engages.
    if B > 16 and _cdiv(B, TB) < 2:
        TB = max(16, _round_up(_cdiv(B, 2), 16))
    grid = (_cdiv(B, TB),)

    flops = 2 * B * (F * H + H * (2 * C - 1))
    bytes_accessed = (x.size * 4 + w1.size * 2 + wcat.size * 2
                      + (b1.size + bcat.size) * 4 + B * OUT_W * 4)

    grid_spec = pltpu.PrefetchScalarGridSpec(
        num_scalar_prefetch=0,
        grid=grid,
        in_specs=[
            pl.BlockSpec((TB, F), lambda i: (i, 0)),        # x tile (f32, cast in-kernel)
            # Resident constants (block index never changes -> fetched once).
            # TODO(synk): for large F*H on v7x (64 MiB VMEM) single-buffer these via
            # pipeline_mode=pl.Buffered(1), set vmem_limit_bytes, and re-derive TB.
            pl.BlockSpec((F, H), lambda i: (0, 0)),         # W1 (bf16)
            pl.BlockSpec((1, H), lambda i: (0, 0)),         # b1 (f32)
            pl.BlockSpec((H, OUT_W), lambda i: (0, 0)),     # [W2 | W2 P.T] padded (bf16)
            pl.BlockSpec((1, OUT_W), lambda i: (0, 0)),     # [b2 | b2 P.T] padded (f32)
        ],
        out_specs=pl.BlockSpec((TB, OUT_W), lambda i: (i, 0)),
    )

    # NOTE: the f32 (TB, OUT_W) slab writes 4*OUT_W B/row for (C+1)*4 B of useful
    # data; emitting bf16 would halve writeback at a small precision cost (logits
    # already passed through a bf16 matmul) -- kept f32 to match PyTorch dtype.
    out = pl.pallas_call(
        functools.partial(_mlp_verif_kernel, n_classes=C),
        grid_spec=grid_spec,
        out_shape=jax.ShapeDtypeStruct((B, OUT_W), jnp.float32),
        compiler_params=pltpu.CompilerParams(
            dimension_semantics=("parallel",)),
        cost_estimate=pl.CostEstimate(
            flops=flops, transcendentals=0, bytes_accessed=bytes_accessed),
    )(x, w1, b1, wcat, bcat)

    logits = out[:, :C]
    verif = out[:, C:C + 1]
    return logits, verif


def attach_property_layers(n_classes: int, true_class_index: int):
    """Rows: +1 at true class, -1 at each other class i != true.  Shape (C-1, C)."""
    rows = []
    for i in range(n_classes):
        if i == true_class_index:
            continue
        row = [0.0] * n_classes
        row[true_class_index] = 1.0
        row[i] = -1.0
        rows.append(row)
    return jnp.asarray(rows, dtype=jnp.float32)


def _init_linear(key, fan_in, fan_out):
    # Deterministic init mimicking torch's default uniform(-1/sqrt(fan_in), ...).
    kw, kb = jax.random.split(key)
    bound = 1.0 / (fan_in ** 0.5)
    w = jax.random.uniform(kw, (fan_in, fan_out), jnp.float32, -bound, bound)
    b = jax.random.uniform(kb, (1, fan_out), jnp.float32, -bound, bound)
    return w, b


def _reference_bf16(x, w1, b1, w2, b2, prop):
    """Mirrors the kernel's bf16-input / f32-accumulate math exactly."""
    h = jnp.maximum(
        jnp.dot(x.astype(jnp.bfloat16), w1.astype(jnp.bfloat16),
                preferred_element_type=jnp.float32) + b1, 0.0)
    hb = h.astype(jnp.bfloat16)
    logits = jnp.dot(hb, w2.astype(jnp.bfloat16),
                     preferred_element_type=jnp.float32) + b2
    r = jnp.dot(hb, (w2 @ prop.T).astype(jnp.bfloat16),
                preferred_element_type=jnp.float32) + b2 @ prop.T
    return logits, jnp.min(r, axis=1, keepdims=True)


def _reference_f32(x, w1, b1, w2, b2, prop):
    """Pure-f32 PyTorch semantics: logits = base(x); verif = min(logits @ P.T, dim=1)."""
    h = jnp.maximum(x @ w1 + b1, 0.0)
    logits = h @ w2 + b2
    r = logits @ prop.T
    return logits, jnp.min(r, axis=1, keepdims=True)


def _check(B, F, H, C, true_class_index, seed=0):
    key = jax.random.PRNGKey(seed)
    kx, k1, k2 = jax.random.split(key, 3)
    x = jax.random.uniform(kx, (B, F), jnp.float32, 0.0, 1.0)
    w1, b1 = _init_linear(k1, F, H)
    w2, b2 = _init_linear(k2, H, C)
    prop = attach_property_layers(C, true_class_index)            # (C-1, C)

    params = prepare_verification_params(w1, b1, w2, b2, prop)    # once per weights/prop
    logits, verif = verification_forward(x, params)
    logits = jax.block_until_ready(logits)
    verif = jax.block_until_ready(verif)
    assert logits.shape == (B, C) and verif.shape == (B, 1)

    # Tight check against a reference that mirrors the kernel's bf16 casts.
    # (Note: verif comes from h @ (W2 P.T) in bf16, not from the returned f32
    #  logits @ P.T -- same composition as PyTorch up to bf16 rounding.)
    ref_logits, ref_verif = _reference_bf16(x, w1, b1, w2, b2, prop)
    assert jnp.allclose(logits, ref_logits, atol=1e-3, rtol=1e-3)
    assert jnp.allclose(verif, ref_verif, atol=1e-3, rtol=1e-3)

    # Loose check against pure-f32 PyTorch semantics (bf16 weight quantization error).
    f32_logits, f32_verif = _reference_f32(x, w1, b1, w2, b2, prop)
    assert jnp.allclose(logits, f32_logits, atol=5e-2, rtol=5e-2)
    assert jnp.allclose(verif, f32_verif, atol=5e-2, rtol=5e-2)


if __name__ == "__main__":
    # Ragged batch, single grid step (B < one tile).
    _check(B=12, F=64, H=32, C=10, true_class_index=3, seed=0)
    # Larger ragged batch, multi-step grid (exercises edge-block masking + both TCs).
    _check(B=100, F=64, H=32, C=10, true_class_index=7, seed=1)

    # TODO(synk): get_lower_bound uses a Gurobi LP solver (no Pallas equivalent);
    # get_upper_bound is plain JAX (random sampling + argmin) around forward_verif.
    print("KERNEL_OK")
</pallas_src>

<mosaic_0001>
module attributes {stable_mosaic.version = 11 : i64} {
  func.func @_mlp_verif_kernel(%arg0: i32, %arg1: memref<16x64xf32, #tpu.memory_space<vmem>>, %arg2: memref<64x32xbf16, #tpu.memory_space<vmem>>, %arg3: memref<1x32xf32, #tpu.memory_space<vmem>>, %arg4: memref<32x128xbf16, #tpu.memory_space<vmem>>, %arg5: memref<1x128xf32, #tpu.memory_space<vmem>>, %arg6: memref<16x128xf32, #tpu.memory_space<vmem>>) attributes {dimension_semantics = [#tpu.dimension_semantics<parallel>], iteration_bounds = array<i64: 1>, scalar_prefetch = 0 : i64, scratch_operands = 0 : i64, tpu.core_type = #tpu.core_type<tc>, window_params = [{transform_indices = @transform_0, window_bounds = array<i64: 16, 64>}, {pipeline_mode = #tpu.pipeline_mode<synchronous>, transform_indices = @transform_1, window_bounds = array<i64: 64, 32>}, {pipeline_mode = #tpu.pipeline_mode<synchronous>, transform_indices = @transform_2, window_bounds = array<i64: 1, 32>}, {pipeline_mode = #tpu.pipeline_mode<synchronous>, transform_indices = @transform_3, window_bounds = array<i64: 32, 128>}, {pipeline_mode = #tpu.pipeline_mode<synchronous>, transform_indices = @transform_4, window_bounds = array<i64: 1, 128>}, {transform_indices = @transform_5, window_bounds = array<i64: 16, 128>}]} {
    %c0 = arith.constant 0 : index
    %c0_0 = arith.constant 0 : index
    %0 = vector.load %arg1[%c0, %c0_0] : memref<16x64xf32, #tpu.memory_space<vmem>>, vector<16x64xf32>
    %1 = arith.truncf %0 : vector<16x64xf32> to vector<16x64xbf16>
    %c0_1 = arith.constant 0 : index
    %c0_2 = arith.constant 0 : index
    %2 = vector.load %arg2[%c0_1, %c0_2] : memref<64x32xbf16, #tpu.memory_space<vmem>>, vector<64x32xbf16>
    %cst = arith.constant dense<0.000000e+00> : vector<16x32xf32>
    %3 = tpu.matmul %1, %2, %cst {dimension_numbers = #tpu.dot_dimension_numbers<[1], [0], [0], [1], [0, 0, 1, 1], [], []>} : vector<16x64xbf16>, vector<64x32xbf16>, vector<16x32xf32> -> vector<16x32xf32>
    %c0_3 = arith.constant 0 : index
    %c0_4 = arith.constant 0 : index
    %4 = vector.load %arg3[%c0_3, %c0_4] : memref<1x32xf32, #tpu.memory_space<vmem>>, vector<1x32xf32>
    %5 = vector.broadcast %4 : vector<1x32xf32> to vector<16x32xf32>
    %6 = arith.addf %3, %5 : vector<16x32xf32>
    %cst_5 = arith.constant 0.000000e+00 : f32
    %7 = vector.broadcast %cst_5 : f32 to vector<16x32xf32>
    %8 = arith.maximumf %6, %7 : vector<16x32xf32>
    %9 = arith.truncf %8 : vector<16x32xf32> to vector<16x32xbf16>
    %c0_6 = arith.constant 0 : index
    %c0_7 = arith.constant 0 : index
    %10 = vector.load %arg4[%c0_6, %c0_7] : memref<32x128xbf16, #tpu.memory_space<vmem>>, vector<32x128xbf16>
    %cst_8 = arith.constant dense<0.000000e+00> : vector<16x128xf32>
    %11 = tpu.matmul %9, %10, %cst_8 {dimension_numbers = #tpu.dot_dimension_numbers<[1], [0], [0], [1], [0, 0, 1, 1], [], []>} : vector<16x32xbf16>, vector<32x128xbf16>, vector<16x128xf32> -> vector<16x128xf32>
    %c0_9 = arith.constant 0 : index
    %c0_10 = arith.constant 0 : index
    %12 = vector.load %arg5[%c0_9, %c0_10] : memref<1x128xf32, #tpu.memory_space<vmem>>, vector<1x128xf32>
    %13 = vector.broadcast %12 : vector<1x128xf32> to vector<16x128xf32>
    %14 = arith.addf %11, %13 : vector<16x128xf32>
    %15 = tpu.iota {dimensions = array<i32: 1>} : vector<16x128xi32>
    %c10_i32 = arith.constant 10 : i32
    %16 = vector.broadcast %c10_i32 : i32 to vector<16x128xi32>
    %17 = arith.cmpi sge, %15, %16 : vector<16x128xi32>
    %c19_i32 = arith.constant 19 : i32
    %18 = vector.broadcast %c19_i32 : i32 to vector<16x128xi32>
    %19 = arith.cmpi slt, %15, %18 : vector<16x128xi32>
    %20 = arith.andi %17, %19 : vector<16x128xi1>
    %cst_11 = arith.constant 0x7F800000 : f32
    %21 = vector.broadcast %cst_11 : f32 to vector<16x128xf32>
    %22 = arith.select %20, %14, %21 : vector<16x128xi1>, vector<16x128xf32>
    %cst_12 = arith.constant dense<0x7F800000> : vector<16xf32>
    %23 = vector.multi_reduction <minimumf>, %22, %cst_12 [1] : vector<16x128xf32> to vector<16xf32>
    %24 = vector.shape_cast %23 : vector<16xf32> to vector<16x1xf32>
    %c10_i32_13 = arith.constant 10 : i32
    %25 = vector.broadcast %c10_i32_13 : i32 to vector<16x128xi32>
    %26 = arith.cmpi eq, %15, %25 : vector<16x128xi32>
    %27 = vector.shape_cast %24 : vector<16x1xf32> to vector<16x1xf32>
    %28 = vector.broadcast %27 : vector<16x1xf32> to vector<16x128xf32>
    %29 = arith.select %26, %28, %14 : vector<16x128xi1>, vector<16x128xf32>
    %c0_14 = arith.constant 0 : index
    %c0_15 = arith.constant 0 : index
    %30 = vector.load %arg6[%c0_14, %c0_15] : memref<16x128xf32, #tpu.memory_space<vmem>>, vector<16x128xf32>
    tpu.vector_store %arg6[%c0_14, %c0_15], %29 {strides = array<i32>} : memref<16x128xf32, #tpu.memory_space<vmem>>, vector<16x128xf32>,
    return
  }
  func.func @transform_0(%arg0: i32) -> (i32, i32) {
    %c0_i32 = arith.constant 0 : i32
    %c0_i32_0 = arith.constant 0 : i32
    return %arg0, %c0_i32 : i32, i32
  }
  func.func @transform_1(%arg0: i32) -> (i32, i32) {
    %c0_i32 = arith.constant 0 : i32
    %c0_i32_0 = arith.constant 0 : i32
    %c0_i32_1 = arith.constant 0 : i32
    return %c0_i32, %c0_i32_0 : i32, i32
  }
  func.func @transform_2(%arg0: i32) -> (i32, i32) {
    %c0_i32 = arith.constant 0 : i32
    %c0_i32_0 = arith.constant 0 : i32
    %c0_i32_1 = arith.constant 0 : i32
    return %c0_i32, %c0_i32_0 : i32, i32
  }
  func.func @transform_3(%arg0: i32) -> (i32, i32) {
    %c0_i32 = arith.constant 0 : i32
    %c0_i32_0 = arith.constant 0 : i32
    %c0_i32_1 = arith.constant 0 : i32
    return %c0_i32, %c0_i32_0 : i32, i32
  }
  func.func @transform_4(%arg0: i32) -> (i32, i32) {
    %c0_i32 = arith.constant 0 : i32
    %c0_i32_0 = arith.constant 0 : i32
    %c0_i32_1 = arith.constant 0 : i32
    return %c0_i32, %c0_i32_0 : i32, i32
  }
  func.func @transform_5(%arg0: i32) -> (i32, i32) {
    %c0_i32 = arith.constant 0 : i32
    %c0_i32_0 = arith.constant 0 : i32
    return %arg0, %c0_i32 : i32, i32
  }
}

</mosaic_0001>

<bundles_post_ra>
// kernel: tpu_custom_call.1
= control target key start
LH: loop header
LB: loop body
LE: loop exit
PB: predicated region body
PF: predicated region fallthrough
CT: control target
= control target key end

     0   :  { %s283_s0 = inlined_call_operand.vmem [shape: f32[12,64], index: 0, kind: input, shape index: {}]   ;;  %s284_s1 = inlined_call_operand.vmem [shape: bf16[64,32], index: 1, kind: input, shape index: {}]   ;;  %s285_s2 = inlined_call_operand.vmem [shape: f32[1,32], index: 2, kind: input, shape index: {}]   ;;  %s286_s3 = inlined_call_operand.vmem [shape: bf16[32,128], index: 3, kind: input, shape index: {}]   ;;  %s287_s4 = inlined_call_operand.vmem [shape: f32[1,128], index: 4, kind: input, shape index: {}]   ;;  %s288_s5 = inlined_call_operand.hbm [shape: f32[12,128], index: 5, kind: output, shape index: {}]  }
   0x1   :  { %v183_v0 = vld [vmem:[%s284_s1 + $0x18] sm:$0xff]  ;;  %v182_v1 = vld [vmem:[%s284_s1 + $0x10] sm:$0xff] }
   0x2   :  { %69 = vmatpush.bf16.msra.mxu0 %v183_v0 }
   0x3   :  { %10 = vsyncpa [#allocation3], 0  ;;  %v181_v2 = vld [vmem:[%s284_s1 + $0x8] sm:$0xff]  ;;  %v180_v3 = vld [vmem:[%s284_s1] sm:$0xff]  ;;  %vm61_vm0 = vcmask 523264   ;;  %vm102_vm1 = vcmask 261120   ;;  %v120_v17 = vlaneseq }
   0x4   :  { %v22_v4 = vld [vmem:[%s283_s0] sm:$0xff]  ;;  %v23_v5 = vld [vmem:[%s283_s0 + $0x8] sm:$0xff]  ;;  %s218_s13 = smov 128   ;;  %s219_s14 = smov 8  }
   0x5   :  { %v24_v6 = vpack.c.bf16 %v23_v5, %v22_v4  ;;  %v185_v7 = vld [vmem:[%s286_s3 + $0x8] sm:$0xff]  ;;  %v184_v8 = vld [vmem:[%s286_s3] sm:$0xff]  ;;  %v121_v18 = vand.u32 127, %v120_v17 }
   0x6   :  { %70 = vmatpush.bf16.msra.mxu0 %v182_v1  ;;  %112 = vmatpush.bf16.msra.mxu1 %v185_v7  ;;  %v189_v10 = vld [vmem:[%s285_s2] ss:$0 sm:$0xff]  ;;  %s217_s2 = smov [#allocation2]  }
   0x7   :  { %v190_v19 = vld [vmem:[%s287_s4] ss:$0 sm:$0xff]  ;;  %vm122_vm2 = vcmp.ge.s32.totalorder %v121_v18, 10  ;;  %vm123_vm3 = vcmp.lt.s32.totalorder %v121_v18, 19  ;;  %vm131_vm5 = vcmp.eq.s32.totalorder %v121_v18, 10  ;;  %s140_s3 = sshll.u32 %s217_s2, 4  ;;  %s141_s3 = int_to_ptr.vmem [resolvable:$true] %s140_s3 }
   0x8   :  { %vm124_vm4 = vmand %vm122_vm2, %vm123_vm3  ;;  %s142_s4 = sshll.u32 %s288_s5, 4  ;;  %s143_s4 = int_to_ptr.hbm [resolvable:$true] %s142_s4 }
   0xa   :  { %71 = vmatpush.bf16.msra.mxu0 %v181_v2  ;;  %113 = vmatpush.bf16.msra.mxu1 %v184_v8 }
   0xe   :  { %72 = vmatpush.bf16.msra.mxu0 %v180_v3 }
  0x11   :  { %170 = vmatmul.msk.bf16.vlgmr.msra.gmra.mxu0 %vm61_vm0, %v24_v6 }
  0x8e   :  { %v74_v9 = vpop.f32.mrf.mxu0 }
  0x8f   :  { %v75_v11 = vadd.f32 %v189_v10, %v74_v9 }
  0x91   :  { %v79_v14 = vmax.f32 %v75_v11, 0.0 }
  0x96   :  { %v76_v12 = vpop.f32.mrf.mxu0 }
  0x97   :  { %v77_v13 = vadd.f32 %v189_v10, %v76_v12 }
  0x99   :  { %v80_v15 = vmax.f32 %v77_v13, 0.0 }
  0x9b   :  { %v81_v16 = vpack.c.bf16 %v80_v15, %v79_v14 }
  0x9d   :  { %179 = vmatmul.msk.bf16.vlgmr.msra.gmra.mxu1 %vm102_vm1, %v81_v16 }
 0x11a   :  { %v115_v20 = vpop.f32.mrf.mxu1 }
 0x11b   :  { %v116_v21 = vadd.f32 %v190_v19, %v115_v20 }
 0x11d   :  { %v125_v22 = vsel %vm124_vm4, %v116_v21, inf }
 0x11e   :  { %127 = vmin.xlane.f32.xlu0 %v125_v22 }
 0x122   :  { %v117_v23 = vpop.f32.mrf.mxu1 }
 0x123   :  { %v118_v24 = vadd.f32 %v190_v19, %v117_v23 }
 0x125   :  { %v126_v25 = vsel %vm124_vm4, %v118_v24, inf }
 0x126   :  { %129 = vmin.xlane.f32.xlu0 %v126_v25 }
 0x191   :  { %v128_v26 = vpop.xlane.xlu0 %127 }
 0x192   :  { %v132_v27 = vsel %vm131_vm5, %v128_v26, %v116_v21 }
 0x193   :  { %134 = vst [vmem:[#allocation2] sm:$0xff] %v132_v27 }
 0x199   :  { %v130_v28 = vpop.xlane.xlu0 %129 }
 0x19a   :  { %v133_v29 = vsel %vm131_vm5, %v130_v28, %v118_v24 }
 0x19b   :  { %135 = vst [vmem:[#allocation2 + $0x8] sm:$0xff] %v133_v29 }
 0x19c   :  { %148 = dma.vmem_to_hbm [thread:$0]  %s141_s3, 256, %s143_s4, [#allocation3], %s218_s13, %s218_s13, %s219_s14  }
 0x19d   :  { %215 = dma.done.wait [#allocation3], 256  }
 0x19e   :  { %216 = vsyncadd [#allocation3], 4294967040 }
 0x19f   :  { %153 = vsyncpa [#allocation3], 1 }

</bundles_post_ra>
